<compile_context>
chip_gen: v7x
topology: tpu7x:2x2x1
jax: 0.10.0
libtpu: 0.0.40
codegen_flags: <defaults>
</compile_context>

<pallas_src>
import functools

import jax
import jax.numpy as jnp
from jax.experimental import pallas as pl
from jax.experimental.pallas import tpu as pltpu


_LANE = 128
_VMEM_LIMIT_BYTES = 48 * 1024 * 1024    # explicit scoped-VMEM request (< v7x 64 MiB physical)
_VMEM_BLOCK_BUDGET = 30 * 1024 * 1024   # what the (double-buffered) blocks may consume
_HBM_STEP_TARGET = 4 * 1024 * 1024      # ~4 MiB of x+out HBM traffic per grid step


def _round_up(v, m):
    return ((v + m - 1) // m) * m


def _sublane_align(dtype):
    # Rows packed per sublane tile: 8 (f32), 16 (bf16), 32 (int8/fp8).
    return 8 * max(1, 4 // jnp.dtype(dtype).itemsize)


def _vmem_block_bytes(rows, cols, dtype):
    # Bytes a (rows, cols) block occupies in VMEM: lanes padded to 128,
    # sublanes padded to the dtype packing factor (captures the 128/K
    # inflation of narrow-K Swin blocks).
    it = jnp.dtype(dtype).itemsize
    return _round_up(rows, _sublane_align(dtype)) * _round_up(cols, _LANE) * it


def _auto_tile_m(M, K, E, in_dtype, out_dtype):
    """Pick the M tile: amortize per-step overhead, respect the VMEM budget,
    keep dtype-aware sublane alignment, prefer a tile that divides M."""
    in_it = jnp.dtype(in_dtype).itemsize
    out_it = jnp.dtype(out_dtype).itemsize
    align = max(_sublane_align(in_dtype), _sublane_align(out_dtype))
    if M <= 256:
        return M                                # single block; block==full dim is legal

    # Target ~_HBM_STEP_TARGET bytes of x+out HBM traffic per step, multiple of 256.
    row_hbm = K * in_it + E * out_it
    tm = max(256, _round_up(_HBM_STEP_TARGET // max(row_hbm, 1), 256))

    # VMEM cap: 2x x-block + 2x out-block + 2x weight + bias within the budget.
    fixed = 2 * _vmem_block_bytes(K, E, in_dtype) + _vmem_block_bytes(1, E, jnp.float32)

    def fits(t):
        return (2 * _vmem_block_bytes(t, K, in_dtype)
                + 2 * _vmem_block_bytes(t, E, out_dtype)
                + fixed) <= _VMEM_BLOCK_BUDGET

    while tm > 256 and not fits(tm):
        tm -= 256
    if tm >= M:
        return M
    tm = max(align, (tm // align) * align)

    # Prefer a tile that divides M exactly (no masked partial tail tile),
    # unless that would shrink the tile by more than 2x.
    for cand in range(tm, align - 1, -align):
        if M % cand == 0:
            if cand * 2 >= tm:
                tm = cand
            break
    return tm


def _patch_embed_kernel(x_ref, w_ref, b_ref, o_ref):
    # x_ref: (TILE_M, K)   flattened patches (C, ph, pw order)
    # w_ref: (K, E)        resident projection weight
    # b_ref: (1, E)        resident bias (f32)
    # o_ref: (TILE_M, E)   unpadded output tile (contiguous HBM writeback)
    acc = jnp.dot(x_ref[...], w_ref[...], preferred_element_type=jnp.float32)
    o_ref[...] = (acc + b_ref[...]).astype(o_ref.dtype)


@functools.partial(jax.jit,
                   static_argnames=("patch_size", "compute_dtype", "out_dtype", "tile_m"))
def patch_embed(x, weight, bias, *, patch_size, compute_dtype=None, out_dtype=None,
                tile_m=None):
    """x: (B, C, H, W); weight: (embed_dim, C, ph, pw); bias: (embed_dim,).

    Returns (B, num_patches, embed_dim) in `out_dtype` (default: x.dtype).
    compute_dtype: optional cast for x/weight — bf16 is recommended on v5e,
    v6e and v7x alike (the kernel is HBM-bound on every generation);
    accumulation and the bias add stay in float32.
    out_dtype: set to jnp.bfloat16 when the downstream block accepts bf16 to
    halve output HBM bytes.
    """
    B, C, H, W = x.shape
    ph = pw = patch_size
    if H % ph != 0 or W % pw != 0:
        raise ValueError(
            f"Input image size ({H}x{W}) not divisible by patch_size {patch_size}.")
    Hp, Wp = H // ph, W // pw
    num_patches = Hp * Wp
    embed_dim = weight.shape[0]
    K = C * ph * pw
    M = B * num_patches

    if out_dtype is None:
        out_dtype = x.dtype
    if compute_dtype is not None:
        x = x.astype(compute_dtype)
        weight = weight.astype(compute_dtype)
    in_dtype = x.dtype

    # im2col: non-overlapping patches flattened in (C, ph, pw) order to match the
    # Conv2d weight layout. allow_input_fusion below lets XLA fuse this producer
    # into the pallas_call input pipeline instead of materializing xp in HBM.
    xp = x.reshape(B, C, Hp, ph, Wp, pw)
    xp = jnp.transpose(xp, (0, 2, 4, 1, 3, 5)).reshape(M, K)

    w2d = weight.reshape(embed_dim, K).T                       # (K, E)
    b2d = bias.astype(jnp.float32).reshape(1, embed_dim)       # (1, E), f32 bias add

    if tile_m is None:
        tm = _auto_tile_m(M, K, embed_dim, in_dtype, out_dtype)
    else:
        align = max(_sublane_align(in_dtype), _sublane_align(out_dtype))
        tm = min(M, max(align, (tile_m // align) * align))
    grid = (pl.cdiv(M, tm),)

    in_it = jnp.dtype(in_dtype).itemsize
    out_it = jnp.dtype(out_dtype).itemsize
    cost = pl.CostEstimate(
        flops=2 * M * K * embed_dim,
        transcendentals=0,
        bytes_accessed=(M * K * in_it + K * embed_dim * in_it
                        + embed_dim * 4 + M * embed_dim * out_it),
    )

    out = pl.pallas_call(
        _patch_embed_kernel,
        out_shape=jax.ShapeDtypeStruct((M, embed_dim), out_dtype),
        grid_spec=pltpu.PrefetchScalarGridSpec(
            num_scalar_prefetch=0,
            grid=grid,
            in_specs=[
                pl.BlockSpec((tm, K), lambda i: (i, 0)),            # streamed patches
                pl.BlockSpec((K, embed_dim), lambda i: (0, 0)),     # resident weight
                pl.BlockSpec((1, embed_dim), lambda i: (0, 0)),     # resident bias
            ],
            out_specs=pl.BlockSpec((tm, embed_dim), lambda i: (i, 0)),
        ),
        compiler_params=pltpu.CompilerParams(
            dimension_semantics=("parallel",),
            vmem_limit_bytes=_VMEM_LIMIT_BYTES,
            allow_input_fusion=[True, False, False],
        ),
        cost_estimate=cost,
    )(xp, w2d, b2d)

    # Metadata-only reshape (array is contiguous, no extra HBM pass).
    return out.reshape(B, num_patches, embed_dim)


def _reference(x, weight, bias, patch_size):
    # Pure-JAX reference: conv2d (stride=kernel=patch) -> flatten(2) -> transpose(1,2)
    y = jax.lax.conv_general_dilated(
        x, weight,
        window_strides=(patch_size, patch_size),
        padding="VALID",
        dimension_numbers=("NCHW", "OIHW", "NCHW"),
    ) + bias.reshape(1, -1, 1, 1)
    B, E, Hp, Wp = y.shape
    return jnp.transpose(y.reshape(B, E, Hp * Wp), (0, 2, 1))


if __name__ == "__main__":
    # Small config consistent with the module: img_size=16, patch_size=4,
    # in_chans=4, embed_dim=32, batch=2, norm_layer=None.
    B, C, H, W = 2, 4, 16, 16
    patch_size = 4
    embed_dim = 32

    key = jax.random.PRNGKey(0)
    kx, kw, kb = jax.random.split(key, 3)
    x = jax.random.normal(kx, (B, C, H, W), dtype=jnp.float32)
    weight = jax.random.normal(kw, (embed_dim, C, patch_size, patch_size),
                               dtype=jnp.float32) * 0.05
    bias = jax.random.normal(kb, (embed_dim,), dtype=jnp.float32) * 0.05

    ref = _reference(x, weight, bias, patch_size)

    # f32 path with a small explicit tile so the multi-step pipelined grid is exercised.
    out = patch_embed(x, weight, bias, patch_size=patch_size, tile_m=16)
    out = jax.block_until_ready(out)
    assert out.shape == (B, (H // patch_size) * (W // patch_size), embed_dim)
    assert jnp.allclose(out, ref, atol=1e-4, rtol=1e-4), "f32 mismatch vs reference"

    # bf16 inputs + bf16 output, auto-sized tile (recommended on v5e/v6e/v7x).
    out_bf16 = patch_embed(x, weight, bias, patch_size=patch_size,
                           compute_dtype=jnp.bfloat16, out_dtype=jnp.bfloat16)
    out_bf16 = jax.block_until_ready(out_bf16)
    assert out_bf16.shape == out.shape and out_bf16.dtype == jnp.bfloat16
    assert jnp.allclose(out_bf16.astype(jnp.float32), ref, atol=5e-2, rtol=5e-2), \
        "bf16 mismatch vs reference"

    print("KERNEL_OK")
</pallas_src>

<mosaic_0001>
module attributes {stable_mosaic.version = 11 : i64} {
  func.func @_patch_embed_kernel(%arg0: i32, %arg1: memref<16x64xf32, #tpu.memory_space<vmem>>, %arg2: memref<64x32xf32, #tpu.memory_space<vmem>>, %arg3: memref<1x32xf32, #tpu.memory_space<vmem>>, %arg4: memref<16x32xf32, #tpu.memory_space<vmem>>) attributes {dimension_semantics = [#tpu.dimension_semantics<parallel>], iteration_bounds = array<i64: 2>, scalar_prefetch = 0 : i64, scratch_operands = 0 : i64, tpu.core_type = #tpu.core_type<tc>, window_params = [{transform_indices = @transform_0, window_bounds = array<i64: 16, 64>}, {pipeline_mode = #tpu.pipeline_mode<synchronous>, transform_indices = @transform_1, window_bounds = array<i64: 64, 32>}, {pipeline_mode = #tpu.pipeline_mode<synchronous>, transform_indices = @transform_2, window_bounds = array<i64: 1, 32>}, {transform_indices = @transform_3, window_bounds = array<i64: 16, 32>}]} {
    %c0 = arith.constant 0 : index
    %c0_0 = arith.constant 0 : index
    %0 = vector.load %arg1[%c0, %c0_0] : memref<16x64xf32, #tpu.memory_space<vmem>>, vector<16x64xf32>
    %c0_1 = arith.constant 0 : index
    %c0_2 = arith.constant 0 : index
    %1 = vector.load %arg2[%c0_1, %c0_2] : memref<64x32xf32, #tpu.memory_space<vmem>>, vector<64x32xf32>
    %cst = arith.constant dense<0.000000e+00> : vector<16x32xf32>
    %2 = tpu.matmul %0, %1, %cst {dimension_numbers = #tpu.dot_dimension_numbers<[1], [0], [0], [1], [0, 0, 1, 1], [], []>} : vector<16x64xf32>, vector<64x32xf32>, vector<16x32xf32> -> vector<16x32xf32>
    %c0_3 = arith.constant 0 : index
    %c0_4 = arith.constant 0 : index
    %3 = vector.load %arg3[%c0_3, %c0_4] : memref<1x32xf32, #tpu.memory_space<vmem>>, vector<1x32xf32>
    %4 = vector.broadcast %3 : vector<1x32xf32> to vector<16x32xf32>
    %5 = arith.addf %2, %4 : vector<16x32xf32>
    %c0_5 = arith.constant 0 : index
    %c0_6 = arith.constant 0 : index
    %6 = vector.load %arg4[%c0_5, %c0_6] : memref<16x32xf32, #tpu.memory_space<vmem>>, vector<16x32xf32>
    tpu.vector_store %arg4[%c0_5, %c0_6], %5 {strides = array<i32>} : memref<16x32xf32, #tpu.memory_space<vmem>>, vector<16x32xf32>,
    return
  }
  func.func @transform_0(%arg0: i32) -> (i32, i32) {
    %c0_i32 = arith.constant 0 : i32
    %c0_i32_0 = arith.constant 0 : i32
    return %arg0, %c0_i32 : i32, i32
  }
  func.func @transform_1(%arg0: i32) -> (i32, i32) {
    %c0_i32 = arith.constant 0 : i32
    %c0_i32_0 = arith.constant 0 : i32
    %c0_i32_1 = arith.constant 0 : i32
    return %c0_i32, %c0_i32_0 : i32, i32
  }
  func.func @transform_2(%arg0: i32) -> (i32, i32) {
    %c0_i32 = arith.constant 0 : i32
    %c0_i32_0 = arith.constant 0 : i32
    %c0_i32_1 = arith.constant 0 : i32
    return %c0_i32, %c0_i32_0 : i32, i32
  }
  func.func @transform_3(%arg0: i32) -> (i32, i32) {
    %c0_i32 = arith.constant 0 : i32
    %c0_i32_0 = arith.constant 0 : i32
    return %arg0, %c0_i32 : i32, i32
  }
}

</mosaic_0001>

<bundles_post_ra>
// kernel: patch_embed.1
= control target key start
LH: loop header
LB: loop body
LE: loop exit
PB: predicated region body
PF: predicated region fallthrough
CT: control target
= control target key end

     0   :  { %8 = vsyncpa [#allocation3], 0  ;;  %s668_s0 = inlined_call_operand.vmem [shape: f32[32,64], index: 0, kind: input, shape index: {}]   ;;  %s669_s1 = inlined_call_operand.vmem [shape: f32[64,32], index: 1, kind: input, shape index: {}]   ;;  %s670_s2 = inlined_call_operand.vmem [shape: f32[1,32], index: 2, kind: input, shape index: {}]   ;;  %s671_s3 = inlined_call_operand.hbm [shape: f32[32,32], index: 3, kind: output, shape index: {}]  }
   0x1   :  { %10 = vsyncpa [#allocation3 + $0x1], 0  ;;  %s539_s12 = smov 0   ;;  %s541_s13 = smov 0  }
   0x2   :  { %s543_s14 = smov 0   ;;  %s545_s15 = smov 0  }
   0x3 LB: > { %s560_s16 = sadd.s32 4294967295, %s514_s15   ;;  %s350_s17 = sadd.s32 4294967294, %s514_s15   ;;  %s514_s15 = sphi %s545_s15, %s677_s15   ;;  %s510_s14 = sphi %s543_s14, %s676_s14   ;;  %s506_s13 = sphi %s541_s13, %s675_s13   ;;  %s502_s12 = sphi %s539_s12, %s674_s12  }
   0x4   : > { %s564_s18 = sadd.s32 1, %s514_s15   ;;  %s91_s19 = sadd.s32 1, %s510_s14 }
   0x5   : > { %s88_s20 = ssub.s32 %s514_s15, %s564_s18  ;;  %p101_p0 = scmp.ne.s32.totalorder %s510_s14, %s506_s13 }
   0x6   : > { %p89_p1 = scmp.eq.s32.totalorder %s88_s20, 0  ;;  %p102_p2 = scmp.eq.s32.totalorder %s560_s16, 1 }
   0x7   : > { %p107_p3 = scmp.ne.s32.totalorder %s506_s13, %s502_s12  ;;  %p108_p4 = scmp.eq.s32.totalorder %s350_s17, 1 }
   0x8   : > { %s575_s21 = scalar_select %p89_p1, %s510_s14, %s91_s19  }
   0x9   : > { %p577_p5 = por %p102_p2, %p101_p0  ;;  %p581_p6 = por %p108_p4, %p107_p3 }
   0xa   : > { %p353_p7 = scmp.ge.s32.totalorder %s514_s15, 1  ;;  %p141_p8 = scmp.lt.s32.totalorder %s514_s15, 3 }
   0xc   : > { %p142_p9 = pnand %p353_p7, %p141_p8 }
   0xd   : > { %v174_v0 = vld [vmem:[%s669_s1] sm:$0xff] (!%p142_p9)  ;;  %v175_v1 = vld [vmem:[%s669_s1 + $0x8] sm:$0xff] (!%p142_p9)  ;;  %v176_v2 = vld [vmem:[%s669_s1 + $0x10] sm:$0xff] (!%p142_p9)  ;;  %s355_s30 = sshll.u32 (!%p142_p9), %s560_s16, 1  ;;  %vm189_vm0 = vcmask (!%p142_p9), 523264   ;;  %s162_s27 = sand.u32 (!%p142_p9), 1, %s506_s13  }
   0xe   : > { %145 = sbr.rel (%p142_p9) target bundleno = 262 (0x106), region = 32  ;;  %v395_v3 = vpack.c.bf16 (!%p142_p9), %v175_v1, %v174_v0  ;;  %v177_v4 = vld [vmem:[%s669_s1 + $0x18] sm:$0xff] (!%p142_p9)  ;;  %p166_p10 = scmp.lt.s32.totalorder (!%p142_p9), %s355_s30, 3  ;;  %v178_v6 = vld [vmem:[%s669_s1 + $0x20] sm:$0xff] (!%p142_p9)  ;;  %v179_v7 = vld [vmem:[%s669_s1 + $0x28] sm:$0xff] (!%p142_p9)  ;;  %vm271_vm1 = vcmask (!%p142_p9), 261120  }
   0xf   : > { %v399_v5 = vpack.c.bf16 (!%p142_p9), %v177_v4, %v176_v2  ;;  %v403_v8 = vpack.c.bf16 (!%p142_p9), %v179_v7, %v178_v6  ;;  %v180_v9 = vld [vmem:[%s669_s1 + $0x30] sm:$0xff] (!%p142_p9)  ;;  %v181_v10 = vld [vmem:[%s669_s1 + $0x38] sm:$0xff] (!%p142_p9)  ;;  %s354_s28 = sshll.u32 (!%p142_p9), %s162_s27, 4  ;;  %v357_v14 = vld [vmem:[%s670_s2] ss:$0 sm:$0xff] (!%p142_p9)  ;;  %s365_s6 = sshll.u32 (!%p142_p9), %s560_s16, 8 }
  0x10   : > { %396 = vmatprep.subr.bf16.mxu0 (!%p142_p9), %v395_v3  ;;  %v407_v12 = vpack.c.bf16 (!%p142_p9), %v181_v10, %v180_v9  ;;  %s164_s4 = scalar_lea.vmem (!%p142_p9), [#allocation2], %s354_s28  ;;  %s625_s9 = scalar_lea.hbm (!%p142_p9), %s671_s3, %s365_s6 }
  0x11   : > { %398 = vmatpush3.bf16.msra.mxu0 (!%p142_p9), %v395_v3  ;;  %s288_s5 = sshll.u32 (!%p142_p9), %s164_s4, 4  ;;  %s516_s11 = smov (!%p142_p9), [#allocation2]   ;;  %s620_s5 = int_to_ptr.vmem [resolvable:$true] %s288_s5 }
  0x12   : > { %400 = vmatprep.subr.bf16.mxu0 (!%p142_p9), %v399_v5  ;;  %s452_s16 = scalar_lea.vmem (!%p142_p9), %s620_s5, 256  ;;  %s456_s17 = sshll.u32 (!%p142_p9), %s516_s11, 4  ;;  %s457_s17 = int_to_ptr.vmem [resolvable:$false] %s456_s17 }
  0x13   : > { %p453_p11 = scmp.ne.s32.totalorder (!%p142_p9), %s620_s5, %s452_s16  ;;  %s458_s19 = scalar_lea.vmem (!%p142_p9), %s457_s17, 512 }
  0x14   : > { %p459_p0 = scmp.lt.s32.totalorder (!%p142_p9), %s620_s5, %s457_s17  ;;  %p460_p1 = scmp.lt.s32.totalorder (!%p142_p9), %s458_s19, %s452_s16 }
  0x15   : > { %s679_s30 = smov (!%p166_p10, %s355_s30), 3  ;;  %402 = vmatpush3.bf16.msra.mxu0 %v399_v5  ;;  %p454_p12 = pnand %p453_p11, %p577_p5 }
  0x16   : > { %s356_s10 = sshll.u32 %s679_s30, 3  ;;  %404 = vmatprep.subr.bf16.mxu0 %v403_v8  ;;  %p461_p2 = por %p460_p1, %p459_p0 }
  0x17   : > { %s169_s26 = scalar_lea.vmem %s668_s0, %s356_s10  ;;  %s627_s10 = scalar_lea.sflag [#allocation3], %s162_s27 }
  0x18   : > { %v172_v11 = vld [vmem:[%s169_s26] sm:$0xff]  ;;  %v173_v13 = vld [vmem:[%s169_s26 + $0x8] sm:$0xff]  ;;  %p455_p13 = pneg %p454_p12 }
  0x19   : > { %392 = vmatprep.mubr.msk.f32.mxu0 %vm189_vm0, %v172_v11  ;;  %406 = vmatpush3.bf16.msra.mxu0 %v403_v8 }
  0x1a   : > { %408 = vmatprep.subr.bf16.mxu0 %v407_v12  ;;  %p462_p3 = pnand %p461_p2, %p455_p13 }
  0x1d   : > { %410 = vmatpush3.bf16.msra.mxu0 %v407_v12 }
  0x20   : > { %393 = vmatmul.mubr.msk.f32.vlgmr.msra.gmra.mrb[0].mxu0 %vm189_vm0, %v173_v13 }
  0xf3   : > { %v394_v15 = vpop.f32.mrb[0].mxu0 }
  0xf4   : > { %v268_v16 = vadd.f32 %v394_v15, %v357_v14  ;;  %v262_v17 = vpop.f32.mrb[1].mxu0 }
  0xf5   : > { %v263_v18 = vadd.f32 %v357_v14, %v262_v17 }
  0xf6   : > { %273 = vst.msk [vmem:[%s164_s4 + $0x8] sm:$0xff] %vm271_vm1, %v268_v16 }
  0xf7   : > { %272 = vst.msk [vmem:[%s164_s4] sm:$0xff] %vm271_vm1, %v263_v18 }
  0xf8   : > { %465 = shalt.err (!%p462_p3)
}
  0xf9   : > { %s466_s20 = scalar_lea.hbm %s625_s9, 256  ;;  %s470_s26 = scalar_lea.hbm %s671_s3, 512 }
  0xfa   : > { %p467_p4 = scmp.ne.s32.totalorder %s625_s9, %s466_s20  ;;  %p471_p9 = scmp.lt.u32.totalorder %s625_s9, %s671_s3 }
  0xfb   : > { %p472_p10 = scmp.lt.u32.totalorder %s470_s26, %s466_s20  ;;  %p474_p12 = scmp.lt.u32.totalorder %s466_s20, %s625_s9 }
  0xfc   : > { %p468_p7 = pnand %p467_p4, %p577_p5 }
  0xfd   : > { %p473_p11 = por %p472_p10, %p471_p9 }
  0xfe   : > { %p469_p8 = pneg %p468_p7 }
  0xff   : > { %p475_p13 = por %p474_p12, %p473_p11 }
 0x101   : > { %p476_p0 = pnand %p475_p13, %p469_p8 }
 0x103   : > { %479 = shalt.err (!%p476_p0)
}
 0x104   : > { %s517_s29 = smov 128   ;;  %s518_s30 = smov 8  }
 0x105   : > { %411 = dma.vmem_to_hbm [thread:$0]  (%p577_p5), %s620_s5, 256, %s625_s9, %s627_s10, %s517_s29, %s517_s29, %s518_s30  }
 0x106 PF: > { %p417_p1 = scmp.ge.s32.totalorder %s514_s15, 2  ;;  %s303_s4 = sand.u32 1, %s502_s12  }
 0x107   : > { %s304_s6 = scalar_lea.sflag [#allocation3], %s303_s4 }
 0x108   : > { %p414_p2 = pnand %p417_p1, %p581_p6 }
 0x10a   : > { %497 = dma.done.wait (!%p414_p2), %s304_s6, 256  }
 0x10b   : > { %499 = vsyncadd (!%p414_p2), %s304_s6, 4294967040  ;;  %p13_p3 = scmp.ge.s32.totalorder %s564_s18, 4   ;;  %s674_s12 = smov %s506_s13 }
 0x10c   : > { %s675_s13 = smov %s510_s14  ;;  %s676_s14 = smov %s575_s21 }
 0x10d   : > { %s677_s15 = smov %s564_s18  ;;  %15 = sbr.rel (!%p13_p3) target bundleno = 3 (0x3), region = 67 }
 0x114   :  { %309 = vsyncpa [#allocation3], 1 }
 0x115   :  { %311 = vsyncpa [#allocation3 + $0x1], 1 }

</bundles_post_ra>
